<compile_context>
chip_gen: v7x
topology: tpu7x:2x2x1
jax: 0.10.0
libtpu: 0.0.40
codegen_flags: <defaults>
</compile_context>

<pallas_src>
import functools

import jax
import jax.numpy as jnp
from jax.experimental import pallas as pl
from jax.experimental.pallas import tpu as pltpu


def _round_up(x: int, m: int) -> int:
    return ((x + m - 1) // m) * m


def _activation(y, kind: str):
    if kind == "relu":          # nn.LeakyReLU() default negative_slope = 0.01
        return jnp.maximum(y, 0.01 * y)
    if kind == "sigmoid":
        return jax.nn.sigmoid(y)
    if kind == "tanh":
        return jnp.tanh(y)
    raise ValueError(f"unsupported activation: {kind}")


def _fused_mlp_kernel(*refs, n_layers: int, activation: str):
    """refs = (x_ref, w1, b1, ..., wN, bN, o_ref). x tile bf16, weights bf16, biases f32."""
    x_ref = refs[0]
    o_ref = refs[-1]
    wb_refs = refs[1:-1]

    h = x_ref[...]                                   # bf16 batch tile (cast done in wrapper)
    y = None
    for i in range(n_layers):
        w_ref = wb_refs[2 * i]
        b_ref = wb_refs[2 * i + 1]
        y = jnp.dot(h, w_ref[...], preferred_element_type=jnp.float32)
        y = y + b_ref[...]                           # (1, N) broadcast, f32 epilogue
        if i != n_layers - 1:
            y = _activation(y, activation)
            h = y.astype(jnp.bfloat16)
    o_ref[...] = y.astype(o_ref.dtype)


def pack_params(params):
    """Pad feature dims to 128 lanes and cast weights to bf16. Call ONCE per param set
    (hoisted out of the per-call path per perf review)."""
    packed = []
    for w, b in params:
        di, do = w.shape
        di_p, do_p = _round_up(di, 128), _round_up(do, 128)
        w_p = jnp.pad(w, ((0, di_p - di), (0, do_p - do))).astype(jnp.bfloat16)
        b_p = jnp.pad(b.reshape(1, -1).astype(jnp.float32), ((0, 0), (0, do_p - do)))
        packed.append((w_p, b_p))
    return packed


def mlp_forward(packed_params, x, out_dim, *, activation: str = "relu", tb: int = 512):
    """Fused MLP forward.

    packed_params: output of pack_params() — [(W_pad:(DiP, Di1P) bf16, b_pad:(1, Di1P) f32)].
    x: (B, D0) float array (unpadded). out_dim: true (unpadded) output feature count.
    """
    batch, d0 = x.shape
    n_layers = len(packed_params)
    d0_pad = packed_params[0][0].shape[0]
    dn_pad = packed_params[-1][0].shape[1]
    dims_pad = [d0_pad] + [w.shape[1] for (w, _) in packed_params]

    # --- batch tiling: derive tile from tile count (<8 rows padding waste/tile) ---
    nt = pl.cdiv(batch, tb)
    if nt == 1 and batch > 8:
        nt = 2                                   # v7x: keep both TensorCores busy
    tb_eff = _round_up(pl.cdiv(batch, nt), 8)    # sublane-aligned batch tile
    batch_pad = nt * tb_eff
    grid = (nt,)

    # x: pad + cast to bf16 in one wrapper pass (halves x DMA and x-tile VMEM).
    x_p = jnp.pad(x.astype(jnp.bfloat16),
                  ((0, batch_pad - batch), (0, d0_pad - d0)))

    # --- specs: blocked, double-buffered x/out tiles; whole-array VMEM-resident weights ---
    in_specs = [pl.BlockSpec((tb_eff, d0_pad), lambda i: (i, 0))]
    flat_params = []
    for w_p, b_p in packed_params:
        flat_params += [w_p, b_p]
        in_specs.append(pl.BlockSpec(memory_space=pltpu.MemorySpace.VMEM))  # resident, single-buffered
        in_specs.append(pl.BlockSpec(memory_space=pltpu.MemorySpace.VMEM))

    out_specs = pl.BlockSpec((tb_eff, dn_pad), lambda i: (i, 0))
    out_shape = jax.ShapeDtypeStruct((batch_pad, dn_pad), jnp.float32)

    # --- VMEM budget (generation-aware) ---------------------------------------
    weight_bytes = sum(w.size * 2 + b.size * 4 for (w, b) in packed_params)  # single-buffered residents
    io_bytes = 2 * tb_eff * d0_pad * 2 + 2 * tb_eff * dn_pad * 4             # double-buffered x / out tiles
    live_bytes = 2 * tb_eff * max(dims_pad) * 4 + tb_eff * max(dims_pad) * 2  # f32 y + bf16 h
    vmem_bytes = weight_bytes + io_bytes + live_bytes
    try:
        vmem_cap = int(pltpu.get_tpu_info().vmem_capacity_bytes)
    except Exception:
        vmem_cap = 64 * 1024 * 1024
    vmem_limit = int(min(max(2 * vmem_bytes, 16 * 1024 * 1024), int(0.875 * vmem_cap)))

    # TODO(synk): for MLPs whose padded bf16 weights exceed a single TensorCore's VMEM
    # (notably v7x's 64 MiB/TC), add an N-tiled / weight-streaming fallback path.

    kernel = functools.partial(_fused_mlp_kernel, n_layers=n_layers, activation=activation)
    out_p = pl.pallas_call(
        kernel,
        out_shape=out_shape,
        grid=grid,
        in_specs=in_specs,
        out_specs=out_specs,
        compiler_params=pltpu.CompilerParams(
            dimension_semantics=("parallel",),   # shard batch tiles across v7x TCs
            vmem_limit_bytes=vmem_limit,
        ),
    )(x_p, *flat_params)

    return out_p[:batch, :out_dim]


def init_mlp_params(key, dimension_list):
    """Deterministic init mirroring nn.Linear's U(-1/sqrt(fan_in), 1/sqrt(fan_in))."""
    params = []
    for i in range(len(dimension_list) - 1):
        fan_in, fan_out = dimension_list[i], dimension_list[i + 1]
        key, kw, kb = jax.random.split(key, 3)
        bound = 1.0 / jnp.sqrt(jnp.float32(fan_in))
        # stored as (in, out) — transposed vs. PyTorch's (out, in)
        w = jax.random.uniform(kw, (fan_in, fan_out), jnp.float32, -bound, bound)
        b = jax.random.uniform(kb, (1, fan_out), jnp.float32, -bound, bound)
        params.append((w, b))
    return params


def mlp_forward_ref_bf16(params, x, activation="relu"):
    """Pure-JAX reference mirroring the kernel's bf16-MXU / f32-accumulate math."""
    n_layers = len(params)
    h = x
    y = None
    for i, (w, b) in enumerate(params):
        y = jnp.dot(h.astype(jnp.bfloat16), w.astype(jnp.bfloat16),
                    preferred_element_type=jnp.float32) + b
        if i != n_layers - 1:
            y = _activation(y, activation)
            h = y
    return y


def mlp_forward_ref_f32(params, x, activation="relu"):
    """Full-precision reference (matches the PyTorch module in f32)."""
    n_layers = len(params)
    for i, (w, b) in enumerate(params):
        x = x @ w + b
        if i != n_layers - 1:
            x = _activation(x, activation)
    return x


if __name__ == "__main__":
    key = jax.random.PRNGKey(0)
    dimension_list = [16, 32, 32, 8]   # MLP([16, 32, 32, 8], activation='relu')
    batch = 8

    kx, kp = jax.random.split(key)
    x = jax.random.normal(kx, (batch, dimension_list[0]), jnp.float32)
    params = init_mlp_params(kp, dimension_list)

    packed = pack_params(params)       # pad + bf16-cast once (hoisted out of the call path)
    out = mlp_forward(packed, x, out_dim=dimension_list[-1], activation="relu")
    out = jax.block_until_ready(out)

    assert out.shape == (batch, dimension_list[-1])

    ref_bf16 = mlp_forward_ref_bf16(params, x)
    ref_f32 = mlp_forward_ref_f32(params, x)
    assert jnp.allclose(out, ref_bf16, atol=1e-2, rtol=1e-2), "mismatch vs bf16-path reference"
    assert jnp.allclose(out, ref_f32, atol=5e-2, rtol=5e-2), "mismatch vs f32 reference"

    print("KERNEL_OK")
</pallas_src>

<mosaic_0001>
module attributes {stable_mosaic.version = 11 : i64} {
  func.func @_fused_mlp_kernel(%arg0: i32, %arg1: memref<8x128xbf16, #tpu.memory_space<vmem>>, %arg2: memref<128x128xbf16, #tpu.memory_space<vmem>>, %arg3: memref<1x128xf32, #tpu.memory_space<vmem>>, %arg4: memref<128x128xbf16, #tpu.memory_space<vmem>>, %arg5: memref<1x128xf32, #tpu.memory_space<vmem>>, %arg6: memref<128x128xbf16, #tpu.memory_space<vmem>>, %arg7: memref<1x128xf32, #tpu.memory_space<vmem>>, %arg8: memref<8x128xf32, #tpu.memory_space<vmem>>) attributes {dimension_semantics = [#tpu.dimension_semantics<parallel>], iteration_bounds = array<i64: 1>, scalar_prefetch = 0 : i64, scratch_operands = 0 : i64, tpu.core_type = #tpu.core_type<tc>, window_params = [{transform_indices = @transform_0, window_bounds = array<i64: 8, 128>}, {pipeline_mode = #tpu.pipeline_mode<synchronous>, transform_indices = @transform_1, window_bounds = array<i64: 128, 128>}, {pipeline_mode = #tpu.pipeline_mode<synchronous>, transform_indices = @transform_2, window_bounds = array<i64: 1, 128>}, {pipeline_mode = #tpu.pipeline_mode<synchronous>, transform_indices = @transform_3, window_bounds = array<i64: 128, 128>}, {pipeline_mode = #tpu.pipeline_mode<synchronous>, transform_indices = @transform_4, window_bounds = array<i64: 1, 128>}, {pipeline_mode = #tpu.pipeline_mode<synchronous>, transform_indices = @transform_5, window_bounds = array<i64: 128, 128>}, {pipeline_mode = #tpu.pipeline_mode<synchronous>, transform_indices = @transform_6, window_bounds = array<i64: 1, 128>}, {transform_indices = @transform_7, window_bounds = array<i64: 8, 128>}]} {
    %c0 = arith.constant 0 : index
    %c0_0 = arith.constant 0 : index
    %0 = vector.load %arg1[%c0, %c0_0] : memref<8x128xbf16, #tpu.memory_space<vmem>>, vector<8x128xbf16>
    %c0_1 = arith.constant 0 : index
    %c0_2 = arith.constant 0 : index
    %1 = vector.load %arg2[%c0_1, %c0_2] : memref<128x128xbf16, #tpu.memory_space<vmem>>, vector<128x128xbf16>
    %cst = arith.constant dense<0.000000e+00> : vector<8x128xf32>
    %2 = tpu.matmul %0, %1, %cst {dimension_numbers = #tpu.dot_dimension_numbers<[1], [0], [0], [1], [0, 0, 1, 1], [], []>} : vector<8x128xbf16>, vector<128x128xbf16>, vector<8x128xf32> -> vector<8x128xf32>
    %c0_3 = arith.constant 0 : index
    %c0_4 = arith.constant 0 : index
    %3 = vector.load %arg3[%c0_3, %c0_4] : memref<1x128xf32, #tpu.memory_space<vmem>>, vector<1x128xf32>
    %4 = vector.broadcast %3 : vector<1x128xf32> to vector<8x128xf32>
    %5 = arith.addf %2, %4 : vector<8x128xf32>
    %cst_5 = arith.constant 0.00999999977 : f32
    %6 = vector.broadcast %cst_5 : f32 to vector<8x128xf32>
    %7 = arith.mulf %6, %5 : vector<8x128xf32>
    %8 = arith.maximumf %5, %7 : vector<8x128xf32>
    %9 = arith.truncf %8 : vector<8x128xf32> to vector<8x128xbf16>
    %c0_6 = arith.constant 0 : index
    %c0_7 = arith.constant 0 : index
    %10 = vector.load %arg4[%c0_6, %c0_7] : memref<128x128xbf16, #tpu.memory_space<vmem>>, vector<128x128xbf16>
    %cst_8 = arith.constant dense<0.000000e+00> : vector<8x128xf32>
    %11 = tpu.matmul %9, %10, %cst_8 {dimension_numbers = #tpu.dot_dimension_numbers<[1], [0], [0], [1], [0, 0, 1, 1], [], []>} : vector<8x128xbf16>, vector<128x128xbf16>, vector<8x128xf32> -> vector<8x128xf32>
    %c0_9 = arith.constant 0 : index
    %c0_10 = arith.constant 0 : index
    %12 = vector.load %arg5[%c0_9, %c0_10] : memref<1x128xf32, #tpu.memory_space<vmem>>, vector<1x128xf32>
    %13 = vector.broadcast %12 : vector<1x128xf32> to vector<8x128xf32>
    %14 = arith.addf %11, %13 : vector<8x128xf32>
    %cst_11 = arith.constant 0.00999999977 : f32
    %15 = vector.broadcast %cst_11 : f32 to vector<8x128xf32>
    %16 = arith.mulf %15, %14 : vector<8x128xf32>
    %17 = arith.maximumf %14, %16 : vector<8x128xf32>
    %18 = arith.truncf %17 : vector<8x128xf32> to vector<8x128xbf16>
    %c0_12 = arith.constant 0 : index
    %c0_13 = arith.constant 0 : index
    %19 = vector.load %arg6[%c0_12, %c0_13] : memref<128x128xbf16, #tpu.memory_space<vmem>>, vector<128x128xbf16>
    %cst_14 = arith.constant dense<0.000000e+00> : vector<8x128xf32>
    %20 = tpu.matmul %18, %19, %cst_14 {dimension_numbers = #tpu.dot_dimension_numbers<[1], [0], [0], [1], [0, 0, 1, 1], [], []>} : vector<8x128xbf16>, vector<128x128xbf16>, vector<8x128xf32> -> vector<8x128xf32>
    %c0_15 = arith.constant 0 : index
    %c0_16 = arith.constant 0 : index
    %21 = vector.load %arg7[%c0_15, %c0_16] : memref<1x128xf32, #tpu.memory_space<vmem>>, vector<1x128xf32>
    %22 = vector.broadcast %21 : vector<1x128xf32> to vector<8x128xf32>
    %23 = arith.addf %20, %22 : vector<8x128xf32>
    %c0_17 = arith.constant 0 : index
    %c0_18 = arith.constant 0 : index
    %24 = vector.load %arg8[%c0_17, %c0_18] : memref<8x128xf32, #tpu.memory_space<vmem>>, vector<8x128xf32>
    tpu.vector_store %arg8[%c0_17, %c0_18], %23 {strides = array<i32>} : memref<8x128xf32, #tpu.memory_space<vmem>>, vector<8x128xf32>,
    return
  }
  func.func @transform_0(%arg0: i32) -> (i32, i32) {
    %c0_i32 = arith.constant 0 : i32
    %c0_i32_0 = arith.constant 0 : i32
    return %arg0, %c0_i32 : i32, i32
  }
  func.func @transform_1(%arg0: i32) -> (i32, i32) {
    %c0_i32 = arith.constant 0 : i32
    %c0_i32_0 = arith.constant 0 : i32
    %c0_i32_1 = arith.constant 0 : i32
    return %c0_i32, %c0_i32_0 : i32, i32
  }
  func.func @transform_2(%arg0: i32) -> (i32, i32) {
    %c0_i32 = arith.constant 0 : i32
    %c0_i32_0 = arith.constant 0 : i32
    %c0_i32_1 = arith.constant 0 : i32
    return %c0_i32, %c0_i32_0 : i32, i32
  }
  func.func @transform_3(%arg0: i32) -> (i32, i32) {
    %c0_i32 = arith.constant 0 : i32
    %c0_i32_0 = arith.constant 0 : i32
    %c0_i32_1 = arith.constant 0 : i32
    return %c0_i32, %c0_i32_0 : i32, i32
  }
  func.func @transform_4(%arg0: i32) -> (i32, i32) {
    %c0_i32 = arith.constant 0 : i32
    %c0_i32_0 = arith.constant 0 : i32
    %c0_i32_1 = arith.constant 0 : i32
    return %c0_i32, %c0_i32_0 : i32, i32
  }
  func.func @transform_5(%arg0: i32) -> (i32, i32) {
    %c0_i32 = arith.constant 0 : i32
    %c0_i32_0 = arith.constant 0 : i32
    %c0_i32_1 = arith.constant 0 : i32
    return %c0_i32, %c0_i32_0 : i32, i32
  }
  func.func @transform_6(%arg0: i32) -> (i32, i32) {
    %c0_i32 = arith.constant 0 : i32
    %c0_i32_0 = arith.constant 0 : i32
    %c0_i32_1 = arith.constant 0 : i32
    return %c0_i32, %c0_i32_0 : i32, i32
  }
  func.func @transform_7(%arg0: i32) -> (i32, i32) {
    %c0_i32 = arith.constant 0 : i32
    %c0_i32_0 = arith.constant 0 : i32
    return %arg0, %c0_i32 : i32, i32
  }
}

</mosaic_0001>

<bundles_post_ra>
// kernel: tpu_custom_call.1
= control target key start
LH: loop header
LB: loop body
LE: loop exit
PB: predicated region body
PF: predicated region fallthrough
CT: control target
= control target key end

     0   :  { %12 = vsyncpa [#allocation3], 0  ;;  %s861_s0 = inlined_call_operand.hbm [shape: bf16[8,128], index: 0, kind: input, shape index: {}]   ;;  %s862_s1 = inlined_call_operand.hbm [shape: bf16[128,128], index: 1, kind: input, shape index: {}]   ;;  %s863_s2 = inlined_call_operand.vmem [shape: f32[1,128], index: 2, kind: input, shape index: {}]   ;;  %s864_s3 = inlined_call_operand.hbm [shape: bf16[128,128], index: 3, kind: input, shape index: {}]   ;;  %s865_s4 = inlined_call_operand.vmem [shape: f32[1,128], index: 4, kind: input, shape index: {}]   ;;  %s866_s5 = inlined_call_operand.hbm [shape: bf16[128,128], index: 5, kind: input, shape index: {}]   ;;  %s867_s6 = inlined_call_operand.vmem [shape: f32[1,128], index: 6, kind: input, shape index: {}]   ;;  %s868_s7 = inlined_call_operand.hbm [shape: f32[8,128], index: 7, kind: output, shape index: {}]  }
   0x1   :  { %13 = vsyncpa [#allocation6], 0 }
   0x2   :  { %14 = vsyncpa [#allocation9], 0 }
   0x3   :  { %15 = vsyncpa [#allocation4], 0  ;;  %s704_s24 = smov [#allocation5]   ;;  %s586_s28 = scalar_lea.hbm %s862_s1, 1024 }
   0x4   :  { %s31_s25 = sshll.u32 %s704_s24, 4  ;;  %p587_p0 = scmp.ne.s32.totalorder %s862_s1, %s586_s28  ;;  %s32_s25 = int_to_ptr.vmem [resolvable:$true] %s31_s25 }
   0x5   :  { %p590_p1 = scmp.lt.u32.totalorder %s586_s28, %s862_s1 }
   0x7   :  { %p592_p2 = pnand %p590_p1, %p587_p0 }
   0x9   :  { %595 = shalt.err (!%p592_p2)
}
   0xa   :  { %s596_s10 = scalar_lea.vmem %s32_s25, 1024  ;;  %p601_p4 = scmp.lt.s32.totalorder %s32_s25, %s32_s25 }
   0xb   :  { %p597_p3 = scmp.ne.s32.totalorder %s32_s25, %s596_s10  ;;  %p602_p5 = scmp.lt.s32.totalorder %s596_s10, %s596_s10 }
   0xd   :  { %p603_p6 = por %p602_p5, %p601_p4 }
   0xf   :  { %p604_p7 = pnand %p603_p6, %p597_p3 }
  0x11   :  { %607 = shalt.err (!%p604_p7)
}
  0x12   :  { %s705_s11 = smov 64   ;;  %s706_s12 = smov 4  }
  0x13   :  { %37 = dma.hbm_to_vmem [thread:$0]  %s862_s1, 1024, %s32_s25, [#allocation6], %s705_s11, %s705_s11, %s706_s12  }
  0x14   :  { %s707_s15 = smov [#allocation2]   ;;  %s708_s17 = smov [#allocation7]  }
  0x15   :  { %s22_s16 = sshll.u32 %s707_s15, 4  ;;  %s45_s18 = sshll.u32 %s708_s17, 4  ;;  %s23_s16 = int_to_ptr.vmem [resolvable:$true] %s22_s16  ;;  %s46_s18 = int_to_ptr.vmem [resolvable:$true] %s45_s18 }
  0x16   :  { %s608_s21 = scalar_lea.hbm %s861_s0, 64 }
  0x17   :  { %p609_p8 = scmp.ne.s32.totalorder %s861_s0, %s608_s21  ;;  %p612_p9 = scmp.lt.u32.totalorder %s608_s21, %s861_s0 }
  0x19   :  { %p614_p10 = pnand %p612_p9, %p609_p8 }
  0x1b   :  { %617 = shalt.err (!%p614_p10)
}
  0x1c   :  { %s618_s1 = scalar_lea.vmem %s23_s16, 64  ;;  %p623_p12 = scmp.lt.s32.totalorder %s23_s16, %s23_s16 }
  0x1d   :  { %p619_p11 = scmp.ne.s32.totalorder %s23_s16, %s618_s1  ;;  %p624_p13 = scmp.lt.s32.totalorder %s618_s1, %s618_s1 }
  0x1f   :  { %p625_p0 = por %p624_p13, %p623_p12 }
  0x21   :  { %p626_p1 = pnand %p625_p0, %p619_p11 }
  0x23   :  { %629 = shalt.err (!%p626_p1)
}
  0x24   :  { %25 = dma.hbm_to_vmem [thread:$0]  %s861_s0, 64, %s23_s16, [#allocation3]  }
  0x25   :  { %s630_s30 = scalar_lea.hbm %s864_s3, 1024 }
  0x26   :  { %p631_p2 = scmp.ne.s32.totalorder %s864_s3, %s630_s30  ;;  %p634_p3 = scmp.lt.u32.totalorder %s630_s30, %s864_s3 }
  0x28   :  { %p636_p4 = pnand %p634_p3, %p631_p2 }
  0x2a   :  { %639 = shalt.err (!%p636_p4)
}
  0x2b   :  { %s640_s14 = scalar_lea.vmem %s46_s18, 1024  ;;  %p645_p6 = scmp.lt.s32.totalorder %s46_s18, %s46_s18 }
  0x2c   :  { %p641_p5 = scmp.ne.s32.totalorder %s46_s18, %s640_s14  ;;  %p646_p7 = scmp.lt.s32.totalorder %s640_s14, %s640_s14 }
  0x2e   :  { %p647_p8 = por %p646_p7, %p645_p6 }
  0x30   :  { %p648_p9 = pnand %p647_p8, %p641_p5 }
  0x32   :  { %651 = shalt.err (!%p648_p9)
}
  0x33   :  { %51 = dma.hbm_to_vmem [thread:$0]  %s864_s3, 1024, %s46_s18, [#allocation6], %s705_s11, %s705_s11, %s706_s12  }
  0x34   :  { %s709_s16 = smov [#allocation8]   ;;  %s652_s21 = scalar_lea.hbm %s866_s5, 1024 }
  0x35   :  { %s59_s17 = sshll.u32 %s709_s16, 4  ;;  %p653_p10 = scmp.ne.s32.totalorder %s866_s5, %s652_s21  ;;  %s60_s17 = int_to_ptr.vmem [resolvable:$true] %s59_s17 }
  0x36   :  { %p656_p11 = scmp.lt.u32.totalorder %s652_s21, %s866_s5 }
  0x38   :  { %p658_p12 = pnand %p656_p11, %p653_p10 }
  0x3a   :  { %661 = shalt.err (!%p658_p12)
}
  0x3b   :  { %s662_s1 = scalar_lea.vmem %s60_s17, 1024  ;;  %p667_p0 = scmp.lt.s32.totalorder %s60_s17, %s60_s17 }
  0x3c   :  { %p663_p13 = scmp.ne.s32.totalorder %s60_s17, %s662_s1  ;;  %p668_p1 = scmp.lt.s32.totalorder %s662_s1, %s662_s1 }
  0x3e   :  { %p669_p2 = por %p668_p1, %p667_p0 }
  0x40   :  { %p670_p3 = pnand %p669_p2, %p663_p13 }
  0x42   :  { %673 = shalt.err (!%p670_p3)
}
  0x43   :  { %65 = dma.hbm_to_vmem [thread:$0]  %s866_s5, 1024, %s60_s17, [#allocation9], %s705_s11, %s705_s11, %s706_s12  }
  0x44   :  { %696 = dma.done.wait [#allocation3], 64  }
  0x45   :  { %697 = vsyncadd [#allocation3], 4294967232 }
  0x46   :  { %698 = dma.done.wait [#allocation6], 2048  }
  0x47   :  { %699 = vsyncadd [#allocation6], 4294965248 }
  0x48   :  { %700 = dma.done.wait [#allocation9], 1024  }
  0x49   :  { %701 = vsyncadd [#allocation9], 4294966272  ;;  %v710_v0 = vmov 0.0   ;;  %vm711_vm0 = vmmov 0   ;;  %v562_v1 = vld [vmem:[#allocation5] sm:$0xff]   ;;  %v563_v2 = vld [vmem:[#allocation5 + $0x8] sm:$0xff]  }
  0x4a   :  { %493 = vmatprep.subr.bf16.mxu0 %v710_v0  ;;  %509 = vmatprep.mubr.msk.bf16.mxu0 %vm711_vm0, %v710_v0  ;;  %v564_v3 = vld [vmem:[#allocation5 + $0x10] sm:$0xff]   ;;  %v570_v4 = vld [vmem:[#allocation7] sm:$0xff]   ;;  %v565_v5 = vld [vmem:[#allocation5 + $0x18] sm:$0xff]   ;;  %s712_s28 = smov [#allocation10]  }
  0x4b   :  { %513 = vmatprep.subr.bf16.mxu1 %v710_v0  ;;  %529 = vmatprep.mubr.msk.bf16.mxu1 %vm711_vm0, %v710_v0  ;;  %v571_v6 = vld [vmem:[#allocation7 + $0x8] sm:$0xff]   ;;  %v566_v7 = vld [vmem:[#allocation5 + $0x20] sm:$0xff]   ;;  %v572_v8 = vld [vmem:[#allocation7 + $0x10] sm:$0xff]   ;;  %s428_s29 = sshll.u32 %s712_s28, 4  ;;  %s429_s29 = int_to_ptr.vmem [resolvable:$true] %s428_s29 }
  0x4c   :  { %494 = vmatpush3.bf16.msra.mxu0 %v562_v1  ;;  %514 = vmatpush3.bf16.msra.mxu1 %v570_v4  ;;  %v567_v9 = vld [vmem:[#allocation5 + $0x28] sm:$0xff]   ;;  %v573_v10 = vld [vmem:[#allocation7 + $0x18] sm:$0xff]   ;;  %v568_v11 = vld [vmem:[#allocation5 + $0x30] sm:$0xff]   ;;  %p679_p5 = scmp.lt.s32.totalorder %s429_s29, %s429_s29 }
  0x4d   :  { %495 = vmatprep.subr.bf16.mxu0 %v710_v0  ;;  %515 = vmatprep.subr.bf16.mxu1 %v710_v0  ;;  %v574_v12 = vld [vmem:[#allocation7 + $0x20] sm:$0xff]   ;;  %v569_v13 = vld [vmem:[#allocation5 + $0x38] sm:$0xff]   ;;  %v575_v14 = vld [vmem:[#allocation7 + $0x28] sm:$0xff]  }
  0x4e   :  { %v81_v15 = vld [vmem:[#allocation2] sm:$0xf]  ;;  %v576_v16 = vld [vmem:[#allocation7 + $0x30] sm:$0xff]   ;;  %v578_v18 = vld [vmem:[#allocation8] sm:$0xff]  }
  0x4f   :  { %v577_v17 = vld [vmem:[#allocation7 + $0x38] sm:$0xff]   ;;  %v579_v19 = vld [vmem:[#allocation8 + $0x8] sm:$0xff]   ;;  %v580_v20 = vld [vmem:[#allocation8 + $0x10] sm:$0xff]  }
  0x50   :  { %496 = vmatpush3.bf16.msra.mxu0 %v563_v2  ;;  %516 = vmatpush3.bf16.msra.mxu1 %v571_v6  ;;  %v581_v21 = vld [vmem:[#allocation8 + $0x18] sm:$0xff]   ;;  %v582_v22 = vld [vmem:[#allocation8 + $0x20] sm:$0xff]   ;;  %v583_v23 = vld [vmem:[#allocation8 + $0x28] sm:$0xff]  }
  0x51   :  { %497 = vmatprep.subr.bf16.mxu0 %v710_v0  ;;  %517 = vmatprep.subr.bf16.mxu1 %v710_v0  ;;  %v439_v24 = vld [vmem:[%s863_s2] ss:$0 sm:$0xff]  ;;  %v584_v33 = vld [vmem:[#allocation8 + $0x30] sm:$0xff]  }
  0x52   :  { %v585_v34 = vld [vmem:[#allocation8 + $0x38] sm:$0xff]  }
  0x53   :  { %v448_v35 = vld [vmem:[%s865_s4] ss:$0 sm:$0xff]  ;;  %s674_s4 = scalar_lea.vmem %s429_s29, 128 }
  0x54   :  { %498 = vmatpush3.bf16.msra.mxu0 %v564_v3  ;;  %518 = vmatpush3.bf16.msra.mxu1 %v572_v8  ;;  %v457_v44 = vld [vmem:[%s867_s6] ss:$0 sm:$0xff]  ;;  %p675_p4 = scmp.ne.s32.totalorder %s429_s29, %s674_s4  ;;  %p680_p6 = scmp.lt.s32.totalorder %s674_s4, %s674_s4 }
  0x55   :  { %499 = vmatprep.subr.bf16.mxu0 %v710_v0  ;;  %519 = vmatprep.subr.bf16.mxu1 %v710_v0 }
  0x56   :  { %p681_p7 = por %p680_p6, %p679_p5 }
  0x58   :  { %500 = vmatpush3.bf16.msra.mxu0 %v565_v5  ;;  %520 = vmatpush3.bf16.msra.mxu1 %v573_v10  ;;  %p682_p8 = pnand %p681_p7, %p675_p4 }
  0x59   :  { %501 = vmatprep.subr.bf16.mxu0 %v710_v0  ;;  %521 = vmatprep.subr.bf16.mxu1 %v710_v0 }
  0x5c   :  { %502 = vmatpush3.bf16.msra.mxu0 %v566_v7  ;;  %522 = vmatpush3.bf16.msra.mxu1 %v574_v12 }
  0x5d   :  { %503 = vmatprep.subr.bf16.mxu0 %v710_v0  ;;  %523 = vmatprep.subr.bf16.mxu1 %v710_v0 }
  0x60   :  { %504 = vmatpush3.bf16.msra.mxu0 %v567_v9  ;;  %524 = vmatpush3.bf16.msra.mxu1 %v575_v14 }
  0x61   :  { %505 = vmatprep.subr.bf16.mxu0 %v710_v0  ;;  %525 = vmatprep.subr.bf16.mxu1 %v710_v0 }
  0x64   :  { %506 = vmatpush3.bf16.msra.mxu0 %v568_v11  ;;  %526 = vmatpush3.bf16.msra.mxu1 %v576_v16 }
  0x65   :  { %507 = vmatprep.subr.bf16.mxu0 %v710_v0  ;;  %527 = vmatprep.subr.bf16.mxu1 %v710_v0 }
  0x68   :  { %508 = vmatpush3.bf16.msra.mxu0 %v569_v13  ;;  %528 = vmatpush3.bf16.msra.mxu1 %v577_v17 }
  0x69   :  { %533 = vmatprep.subr.bf16.mxu0 %v710_v0 }
  0x6b   :  { %510 = vmatmul.mubr.bf16.vlgmr.msra.gmra.mrb[0].mxu0 %v81_v15 }
  0x6c   :  { %549 = vmatprep.mubr.msk.bf16.mxu0 %vm711_vm0, %v710_v0  ;;  %534 = vmatpush3.bf16.msra.mxu0 %v578_v18 }
  0x6d   :  { %535 = vmatprep.subr.bf16.mxu0 %v710_v0 }
  0x70   :  { %536 = vmatpush3.bf16.msra.mxu0 %v579_v19 }
  0x71   :  { %537 = vmatprep.subr.bf16.mxu0 %v710_v0 }
  0x74   :  { %538 = vmatpush3.bf16.msra.mxu0 %v580_v20 }
  0x75   :  { %539 = vmatprep.subr.bf16.mxu0 %v710_v0 }
  0x78   :  { %540 = vmatpush3.bf16.msra.mxu0 %v581_v21 }
  0x79   :  { %541 = vmatprep.subr.bf16.mxu0 %v710_v0 }
  0x7c   :  { %542 = vmatpush3.bf16.msra.mxu0 %v582_v22 }
  0x7d   :  { %543 = vmatprep.subr.bf16.mxu0 %v710_v0 }
  0x80   :  { %544 = vmatpush3.bf16.msra.mxu0 %v583_v23 }
  0x81   :  { %545 = vmatprep.subr.bf16.mxu0 %v710_v0 }
  0x84   :  { %546 = vmatpush3.bf16.msra.mxu0 %v584_v33 }
  0x85   :  { %547 = vmatprep.subr.bf16.mxu0 %v710_v0 }
  0x88   :  { %548 = vmatpush3.bf16.msra.mxu0 %v585_v34 }
 0x13e   :  { %v187_v25 = vpop.f32.mrb[0].mxu0 }
 0x13f   :  { %v188_v26 = vadd.f32 %v439_v24, %v187_v25  ;;  %v511_v27 = vpop.f32.mrb[1].mxu0 }
 0x140   :  { %v190_v28 = vpop.f32.mrb[2].mxu0 }
 0x141   :  { %v193_v29 = vmul.f32 0.01, %v188_v26  ;;  %v512_v30 = vpop.f32.mrb[3].mxu0 }
 0x143   :  { %v194_v31 = vmax.f32 %v188_v26, %v193_v29 }
 0x145   :  { %v195_v32 = vpack.c.bf16 %v194_v31, %v194_v31 }
 0x147   :  { %530 = vmatmul.mubr.bf16.vlgmr.msra.gmra.mrb[0].mxu1 %v195_v32 }
 0x21a   :  { %v301_v36 = vpop.f32.mrb[0].mxu1 }
 0x21b   :  { %v302_v37 = vadd.f32 %v448_v35, %v301_v36  ;;  %v531_v38 = vpop.f32.mrb[1].mxu1 }
 0x21c   :  { %v304_v39 = vpop.f32.mrb[2].mxu1 }
 0x21d   :  { %v307_v40 = vmul.f32 0.01, %v302_v37  ;;  %v532_v41 = vpop.f32.mrb[3].mxu1 }
 0x21f   :  { %v308_v42 = vmax.f32 %v302_v37, %v307_v40 }
 0x221   :  { %v309_v43 = vpack.c.bf16 %v308_v42, %v308_v42 }
 0x223   :  { %550 = vmatmul.mubr.bf16.vlgmr.msra.gmra.mrb[4].mxu0 %v309_v43 }
 0x2f6   :  { %v415_v45 = vpop.f32.mrb[4].mxu0 }
 0x2f7   :  { %v416_v46 = vadd.f32 %v457_v44, %v415_v45  ;;  %v551_v47 = vpop.f32.mrb[5].mxu0 }
 0x2f8   :  { %v418_v48 = vpop.f32.mrb[6].mxu0 }
 0x2f9   :  { %421 = vst [vmem:[#allocation10] sm:$0xff] %v416_v46  ;;  %v552_v49 = vpop.f32.mrb[7].mxu0 }
 0x2fa   :  { %685 = shalt.err (!%p682_p8)
}
 0x2fb   :  { %s686_s6 = scalar_lea.hbm %s868_s7, 128 }
 0x2fc   :  { %p687_p9 = scmp.ne.s32.totalorder %s868_s7, %s686_s6  ;;  %p690_p10 = scmp.lt.u32.totalorder %s686_s6, %s868_s7 }
 0x2fe   :  { %p692_p11 = pnand %p690_p10, %p687_p9 }
 0x300   :  { %695 = shalt.err (!%p692_p11)
}
 0x301   :  { %431 = dma.vmem_to_hbm [thread:$0]  %s429_s29, 128, %s868_s7, [#allocation4]  }
 0x302   :  { %702 = dma.done.wait [#allocation4], 128  }
 0x303   :  { %703 = vsyncadd [#allocation4], 4294967168 }
 0x304   :  { %435 = vsyncpa [#allocation3], 1 }
 0x305   :  { %436 = vsyncpa [#allocation6], 1 }
 0x306   :  { %437 = vsyncpa [#allocation9], 1 }
 0x307   :  { %438 = vsyncpa [#allocation4], 1 }

</bundles_post_ra>
